<compile_context>
chip_gen: v7x
topology: tpu7x:2x2x1
jax: 0.10.0
libtpu: 0.0.40
codegen_flags: <defaults>
</compile_context>

<pallas_src>
import functools
import math

import jax
import jax.numpy as jnp
from jax.experimental import pallas as pl
from jax.experimental.pallas import tpu as pltpu

C1 = 0.01 ** 2
C2 = 0.03 ** 2


# ----------------------------------------------------------------------------
# Constant construction (trace-time, constant-folded under jit).
# ----------------------------------------------------------------------------
def _gaussian_1d(window_size: int, sigma: float) -> jnp.ndarray:
    x = jnp.arange(window_size, dtype=jnp.float32)
    center = window_size // 2
    g = jnp.exp(-((x - center) ** 2) / (2.0 * sigma ** 2))
    return g / jnp.sum(g)


def _band_matrix(n: int, g: jnp.ndarray, pad: int) -> jnp.ndarray:
    """G[i, k] = g[k - i + pad] if in range else 0 (zero-padded conv as matmul)."""
    idx = jnp.arange(n)
    diff = idx[None, :] - idx[:, None] + pad
    valid = (diff >= 0) & (diff < g.shape[0])
    return jnp.where(valid, g[jnp.clip(diff, 0, g.shape[0] - 1)], 0.0).astype(jnp.float32)


# ----------------------------------------------------------------------------
# Static tiling / batching decisions (plain Python ints).
# ----------------------------------------------------------------------------
def _min_sublane_tile(dtype) -> int:
    return {4: 8, 2: 16, 1: 32}.get(jnp.dtype(dtype).itemsize, 8)


def _vmem_capacity_bytes() -> int:
    try:
        cap = getattr(pltpu.get_tpu_info(), "vmem_capacity_bytes", None)
        if cap:
            return int(cap)
    except Exception:
        pass
    return 64 * 1024 * 1024          # conservative (v7x-sized) fallback


def _lane_pack_factor(n: int) -> int:
    """Images packed side-by-side along the lane axis (only when n | 128)."""
    if n < 128 and 128 % n == 0:
        return 128 // n
    return 1


def _choose_bsz(n_super, h, lane_w, in_dtype, vmem_budget, max_super=None):
    """Super-images per grid step: fill the VMEM budget, keep sublane alignment."""
    per_super = 112 * h * lane_w                 # ~live bytes per in-flight super-image
    fit = max(1, int(vmem_budget) // per_super)
    if max_super is not None:
        fit = max(1, min(fit, max_super))
    if fit >= n_super:
        return n_super                           # one step: block == full extent
    min_sub = _min_sublane_tile(in_dtype)
    q = min_sub // math.gcd(h, min_sub)          # bsz must be a multiple of q
    return max(q, (fit // q) * q)


def _row_group(bsz: int, h: int, conv_dtype) -> int:
    """How many h-row tiles to fuse into one block-diag Gh left-matmul."""
    total = 5 * bsz
    target = max(1, 128 // h)                    # keep the contraction dim ~128
    tile = _min_sublane_tile(conv_dtype)
    best, best_aligned = 1, 0
    for cand in range(1, min(target, total) + 1):
        if total % cand == 0:
            best = cand
            if (cand * h) % tile == 0:
                best_aligned = cand
    return best_aligned if best_aligned else best


# ----------------------------------------------------------------------------
# Kernel: one grid step = bsz lane-packed "super-images".
# ----------------------------------------------------------------------------
def _ssim_partial_kernel(x1_ref, x2_ref, gwT_ref, ghB_ref, out_ref, *, exact_div):
    lw = gwT_ref.shape[1]            # kw * W   (lane width)
    ghr = ghB_ref.shape[0]           # g  * H   (rows per H-conv matmul)
    rows = x1_ref.shape[0]           # bsz * H
    conv_dtype = gwT_ref.dtype

    x1 = x1_ref[...].astype(jnp.float32)          # (bsz*H, lw)
    x2 = x2_ref[...].astype(jnp.float32)

    # 5 conv operands.  Products are formed in f32 (the sigma subtraction is
    # cancellation-sensitive); each slab is cast to the MXU dtype individually
    # so no full-size f32 staging buffer is materialized.
    stacked = jnp.concatenate([
        x1.astype(conv_dtype),
        x2.astype(conv_dtype),
        (x1 * x1).astype(conv_dtype),
        (x2 * x2).astype(conv_dtype),
        (x1 * x2).astype(conv_dtype),
    ], axis=0)                                                     # (5*rows, lw)

    # W-direction conv: ONE MXU matmul.  The block-diagonal Gw keeps the
    # lane-packed images independent.  Accumulate in f32, then drop to the
    # MXU dtype so the second conv's operand is half the bytes.
    a = jnp.dot(stacked, gwT_ref[...],
                preferred_element_type=jnp.float32).astype(conv_dtype)

    # H-direction conv: block-diagonal Gh applied from the LEFT.  No
    # transposes at all; the result keeps `a`'s row/lane layout exactly.
    nb = (5 * rows) // ghr
    if nb == 1:
        c = jnp.dot(ghB_ref[...], a, preferred_element_type=jnp.float32)
    else:
        a3 = a.reshape(nb, ghr, lw)
        ghb = jnp.broadcast_to(ghB_ref[...], (nb, ghr, ghr))
        c = jnp.einsum('bij,bjl->bil', ghb, a3,
                       preferred_element_type=jnp.float32)

    # Split the 5 conv results on the leading axis (no slab slices / copies).
    c = c.reshape(5, rows, lw)
    mu1, mu2, s11, s22, s12 = c[0], c[1], c[2], c[3], c[4]

    mu1_sq = mu1 * mu1
    mu2_sq = mu2 * mu2
    mu1_mu2 = mu1 * mu2
    # Clamp: bf16 matmul rounding can push E[x^2] - mu^2 slightly negative in
    # flat regions (|err| can exceed C2), which could flip the sign of `den`.
    sigma1_sq = jnp.maximum(s11 - mu1_sq, 0.0)
    sigma2_sq = jnp.maximum(s22 - mu2_sq, 0.0)
    sigma12 = s12 - mu1_mu2

    num = (2.0 * mu1_mu2 + C1) * (2.0 * sigma12 + C2)
    den = (mu1_sq + mu2_sq + C1) * (sigma1_sq + sigma2_sq + C2)
    if exact_div:
        ssim_map = num / den
    else:
        ssim_map = num * pl.reciprocal(den, approx=True)   # den >= C1*C2 > 0

    # Sublane-only partial reduce; the 128-wide lane sum finishes in the
    # host-side glue, keeping cross-lane XLU work out of the epilogue.
    out_ref[...] = jnp.sum(ssim_map, axis=0, keepdims=True).reshape(1, 1, lw)


# ----------------------------------------------------------------------------
# Wrapper: SSIMLoss(window_size=11, size_average=True)(img1, img2).
# ----------------------------------------------------------------------------
def ssim_loss(img1: jnp.ndarray, img2: jnp.ndarray,
              window_size: int = 11, sigma: float = 1.5,
              conv_dtype=jnp.bfloat16, max_images_per_step=None) -> jnp.ndarray:
    """conv_dtype: MXU operand dtype (bf16 fast / ~1e-3 deviation; float32 exact)."""
    n, ch, h, w = img1.shape
    nc = n * ch
    pad = window_size // 2
    exact = (jnp.dtype(conv_dtype) == jnp.dtype(jnp.float32))

    # --- static tiling decisions ------------------------------------------------
    kw = _lane_pack_factor(w)                    # images packed along lanes
    lw = kw * w
    n_super = -(-nc // kw)
    vmem_cap = _vmem_capacity_bytes()
    max_super = None
    if max_images_per_step is not None:
        max_super = max(1, int(max_images_per_step) // kw)
    bsz = _choose_bsz(n_super, h, lw, img1.dtype, vmem_cap // 3, max_super)
    steps = -(-n_super // bsz)
    n_super_pad = steps * bsz
    nc_pad = n_super_pad * kw
    pad_imgs = nc_pad - nc                       # zero images appended
    g_rows = _row_group(bsz, h, conv_dtype)

    # --- constant Gaussian matrices (block-diag => packed tiles stay independent)
    g1d = _gaussian_1d(window_size, sigma)
    gw = _band_matrix(w, g1d, pad)                                          # (W, W)
    gh = _band_matrix(h, g1d, pad)                                          # (H, H)
    gwT = jnp.kron(jnp.eye(kw, dtype=jnp.float32), gw.T).astype(conv_dtype)     # (lw, lw)
    ghB = jnp.kron(jnp.eye(g_rows, dtype=jnp.float32), gh).astype(conv_dtype)   # (gH, gH)

    # --- pack NCHW -> (n_super_pad*H, kw*W), zero-padding whole images -----------
    def pack(x):
        x = x.reshape(nc, h, w)
        if pad_imgs:
            x = jnp.concatenate([x, jnp.zeros((pad_imgs, h, w), x.dtype)], axis=0)
        x = x.reshape(n_super_pad, kw, h, w)
        x = jnp.transpose(x, (0, 2, 1, 3))
        return x.reshape(n_super_pad * h, lw)

    x1 = pack(img1)
    x2 = pack(img2)

    kernel = functools.partial(_ssim_partial_kernel, exact_div=exact)
    partials = pl.pallas_call(
        kernel,
        out_shape=jax.ShapeDtypeStruct((steps, 1, lw), jnp.float32),
        grid_spec=pltpu.PrefetchScalarGridSpec(
            num_scalar_prefetch=0,
            grid=(steps,),
            in_specs=[
                pl.BlockSpec((bsz * h, lw), lambda i: (i, 0)),
                pl.BlockSpec((bsz * h, lw), lambda i: (i, 0)),
                pl.BlockSpec((lw, lw), lambda i: (0, 0)),
                pl.BlockSpec((g_rows * h, g_rows * h), lambda i: (0, 0)),
            ],
            out_specs=pl.BlockSpec((1, 1, lw), lambda i: (i, 0, 0)),
        ),
        compiler_params=pltpu.CompilerParams(
            dimension_semantics=("parallel",),
            vmem_limit_bytes=int(vmem_cap * 3 // 4),
        ),
    )(x1, x2, gwT, ghB)

    ssim_sum = jnp.sum(partials)
    # Padded zero-vs-zero images score exactly 1.0 per pixel; remove them.
    ssim_sum = ssim_sum - jnp.float32(pad_imgs * h * w)
    ssim_mean = ssim_sum / jnp.float32(nc * h * w)
    # SSIMLoss.forward: 1 - (1 + ssim) / 2
    return 1.0 - (1.0 + ssim_mean) / 2.0


# ----------------------------------------------------------------------------
# Pure-JAX f32 reference of the PyTorch module (for validation).
# ----------------------------------------------------------------------------
def _ssim_loss_reference(img1, img2, window_size: int = 11, sigma: float = 1.5):
    _, _, h, w = img1.shape
    pad = window_size // 2
    g = _gaussian_1d(window_size, sigma)
    gh = _band_matrix(h, g, pad)
    gw = _band_matrix(w, g, pad)

    def conv(x):
        return jnp.einsum('ij,ncjk,lk->ncil', gh, x.astype(jnp.float32), gw)

    a = img1.astype(jnp.float32)
    b = img2.astype(jnp.float32)
    mu1, mu2 = conv(a), conv(b)
    mu1_sq, mu2_sq, mu1_mu2 = mu1 * mu1, mu2 * mu2, mu1 * mu2
    sigma1_sq = conv(a * a) - mu1_sq
    sigma2_sq = conv(b * b) - mu2_sq
    sigma12 = conv(a * b) - mu1_mu2
    ssim_map = ((2 * mu1_mu2 + C1) * (2 * sigma12 + C2)
                / ((mu1_sq + mu2_sq + C1) * (sigma1_sq + sigma2_sq + C2)))
    return 1.0 - (1.0 + jnp.mean(ssim_map)) / 2.0


if __name__ == "__main__":
    key = jax.random.PRNGKey(0)
    k1, k2, k3, k4, k5, k6 = jax.random.split(key, 6)

    # Primary case (matches the module's typical small-test shapes).
    N, C, H, W = 2, 4, 16, 16
    img1 = jax.random.uniform(k1, (N, C, H, W), dtype=jnp.float32)
    img2 = jax.random.uniform(k2, (N, C, H, W), dtype=jnp.float32)
    loss = jax.block_until_ready(jax.jit(ssim_loss)(img1, img2))
    ref = jax.block_until_ready(jax.jit(_ssim_loss_reference)(img1, img2))
    assert jnp.isfinite(loss), "non-finite loss"
    assert abs(float(loss) - float(ref)) < 5e-2, (float(loss), float(ref))

    # Ragged N*C (15 images) + forced multi-step grid + one zero-padded image.
    a1 = jax.random.uniform(k3, (3, 5, 16, 16), dtype=jnp.float32)
    a2 = jax.random.uniform(k4, (3, 5, 16, 16), dtype=jnp.float32)
    loss2 = jax.block_until_ready(
        jax.jit(functools.partial(ssim_loss, max_images_per_step=8))(a1, a2))
    ref2 = jax.block_until_ready(jax.jit(_ssim_loss_reference)(a1, a2))
    assert jnp.isfinite(loss2), "non-finite loss (ragged case)"
    assert abs(float(loss2) - float(ref2)) < 5e-2, (float(loss2), float(ref2))

    # Larger N*C: exercises the batched (multi-group) H-conv path.
    b1 = jax.random.uniform(k5, (4, 8, 16, 16), dtype=jnp.float32)
    b2 = jax.random.uniform(k6, (4, 8, 16, 16), dtype=jnp.float32)
    loss3 = jax.block_until_ready(jax.jit(ssim_loss)(b1, b2))
    ref3 = jax.block_until_ready(jax.jit(_ssim_loss_reference)(b1, b2))
    assert jnp.isfinite(loss3), "non-finite loss (batched case)"
    assert abs(float(loss3) - float(ref3)) < 5e-2, (float(loss3), float(ref3))

    print("KERNEL_OK")
</pallas_src>

<mosaic_0001>
module attributes {stable_mosaic.version = 11 : i64} {
  func.func @_ssim_partial_kernel(%arg0: i32, %arg1: memref<16x128xf32, #tpu.memory_space<vmem>>, %arg2: memref<16x128xf32, #tpu.memory_space<vmem>>, %arg3: memref<128x128xbf16, #tpu.memory_space<vmem>>, %arg4: memref<80x80xbf16, #tpu.memory_space<vmem>>, %arg5: memref<1x1x128xf32, #tpu.memory_space<vmem>>) attributes {dimension_semantics = [#tpu.dimension_semantics<parallel>], iteration_bounds = array<i64: 1>, scalar_prefetch = 0 : i64, scratch_operands = 0 : i64, tpu.core_type = #tpu.core_type<tc>, window_params = [{transform_indices = @transform_0, window_bounds = array<i64: 16, 128>}, {transform_indices = @transform_1, window_bounds = array<i64: 16, 128>}, {pipeline_mode = #tpu.pipeline_mode<synchronous>, transform_indices = @transform_2, window_bounds = array<i64: 128, 128>}, {pipeline_mode = #tpu.pipeline_mode<synchronous>, transform_indices = @transform_3, window_bounds = array<i64: 80, 80>}, {transform_indices = @transform_4, window_bounds = array<i64: 1, 1, 128>}]} {
    %c0 = arith.constant 0 : index
    %c0_0 = arith.constant 0 : index
    %0 = vector.load %arg1[%c0, %c0_0] : memref<16x128xf32, #tpu.memory_space<vmem>>, vector<16x128xf32>
    %c0_1 = arith.constant 0 : index
    %c0_2 = arith.constant 0 : index
    %1 = vector.load %arg2[%c0_1, %c0_2] : memref<16x128xf32, #tpu.memory_space<vmem>>, vector<16x128xf32>
    %2 = arith.truncf %0 : vector<16x128xf32> to vector<16x128xbf16>
    %3 = arith.truncf %1 : vector<16x128xf32> to vector<16x128xbf16>
    %4 = arith.mulf %0, %0 : vector<16x128xf32>
    %5 = arith.truncf %4 : vector<16x128xf32> to vector<16x128xbf16>
    %6 = arith.mulf %1, %1 : vector<16x128xf32>
    %7 = arith.truncf %6 : vector<16x128xf32> to vector<16x128xbf16>
    %8 = arith.mulf %0, %1 : vector<16x128xf32>
    %9 = arith.truncf %8 : vector<16x128xf32> to vector<16x128xbf16>
    %10 = tpu.concatenate %2, %3, %5, %7, %9 in 0 : vector<16x128xbf16>, vector<16x128xbf16>, vector<16x128xbf16>, vector<16x128xbf16>, vector<16x128xbf16> -> vector<80x128xbf16>
    %c0_3 = arith.constant 0 : index
    %c0_4 = arith.constant 0 : index
    %11 = vector.load %arg3[%c0_3, %c0_4] : memref<128x128xbf16, #tpu.memory_space<vmem>>, vector<128x128xbf16>
    %cst = arith.constant dense<0.000000e+00> : vector<80x128xf32>
    %12 = tpu.matmul %10, %11, %cst {dimension_numbers = #tpu.dot_dimension_numbers<[1], [0], [0], [1], [0, 0, 1, 1], [], []>} : vector<80x128xbf16>, vector<128x128xbf16>, vector<80x128xf32> -> vector<80x128xf32>
    %13 = arith.truncf %12 : vector<80x128xf32> to vector<80x128xbf16>
    %c0_5 = arith.constant 0 : index
    %c0_6 = arith.constant 0 : index
    %14 = vector.load %arg4[%c0_5, %c0_6] : memref<80x80xbf16, #tpu.memory_space<vmem>>, vector<80x80xbf16>
    %cst_7 = arith.constant dense<0.000000e+00> : vector<80x128xf32>
    %15 = tpu.matmul %14, %13, %cst_7 {dimension_numbers = #tpu.dot_dimension_numbers<[1], [0], [0], [1], [0, 0, 1, 1], [], []>} : vector<80x80xbf16>, vector<80x128xbf16>, vector<80x128xf32> -> vector<80x128xf32>
    %16 = vector.shape_cast %15 : vector<80x128xf32> to vector<5x16x128xf32>
    %17 = vector.extract_strided_slice %16 {offsets = [0, 0, 0], sizes = [1, 16, 128], strides = [1, 1, 1]} : vector<5x16x128xf32> to vector<1x16x128xf32>
    %18 = vector.shape_cast %17 : vector<1x16x128xf32> to vector<16x128xf32>
    %19 = vector.extract_strided_slice %16 {offsets = [1, 0, 0], sizes = [1, 16, 128], strides = [1, 1, 1]} : vector<5x16x128xf32> to vector<1x16x128xf32>
    %20 = vector.shape_cast %19 : vector<1x16x128xf32> to vector<16x128xf32>
    %21 = vector.extract_strided_slice %16 {offsets = [2, 0, 0], sizes = [1, 16, 128], strides = [1, 1, 1]} : vector<5x16x128xf32> to vector<1x16x128xf32>
    %22 = vector.shape_cast %21 : vector<1x16x128xf32> to vector<16x128xf32>
    %23 = vector.extract_strided_slice %16 {offsets = [3, 0, 0], sizes = [1, 16, 128], strides = [1, 1, 1]} : vector<5x16x128xf32> to vector<1x16x128xf32>
    %24 = vector.shape_cast %23 : vector<1x16x128xf32> to vector<16x128xf32>
    %25 = vector.extract_strided_slice %16 {offsets = [4, 0, 0], sizes = [1, 16, 128], strides = [1, 1, 1]} : vector<5x16x128xf32> to vector<1x16x128xf32>
    %26 = vector.shape_cast %25 : vector<1x16x128xf32> to vector<16x128xf32>
    %27 = arith.mulf %18, %18 : vector<16x128xf32>
    %28 = arith.mulf %20, %20 : vector<16x128xf32>
    %29 = arith.mulf %18, %20 : vector<16x128xf32>
    %30 = arith.subf %22, %27 : vector<16x128xf32>
    %cst_8 = arith.constant 0.000000e+00 : f32
    %31 = vector.broadcast %cst_8 : f32 to vector<16x128xf32>
    %32 = arith.maximumf %30, %31 : vector<16x128xf32>
    %33 = arith.subf %24, %28 : vector<16x128xf32>
    %cst_9 = arith.constant 0.000000e+00 : f32
    %34 = vector.broadcast %cst_9 : f32 to vector<16x128xf32>
    %35 = arith.maximumf %33, %34 : vector<16x128xf32>
    %36 = arith.subf %26, %29 : vector<16x128xf32>
    %cst_10 = arith.constant 2.000000e+00 : f32
    %37 = vector.broadcast %cst_10 : f32 to vector<16x128xf32>
    %38 = arith.mulf %37, %29 : vector<16x128xf32>
    %cst_11 = arith.constant 9.99999974E-5 : f32
    %39 = vector.broadcast %cst_11 : f32 to vector<16x128xf32>
    %40 = arith.addf %38, %39 : vector<16x128xf32>
    %cst_12 = arith.constant 2.000000e+00 : f32
    %41 = vector.broadcast %cst_12 : f32 to vector<16x128xf32>
    %42 = arith.mulf %41, %36 : vector<16x128xf32>
    %cst_13 = arith.constant 8.99999984E-4 : f32
    %43 = vector.broadcast %cst_13 : f32 to vector<16x128xf32>
    %44 = arith.addf %42, %43 : vector<16x128xf32>
    %45 = arith.mulf %40, %44 : vector<16x128xf32>
    %46 = arith.addf %27, %28 : vector<16x128xf32>
    %cst_14 = arith.constant 9.99999974E-5 : f32
    %47 = vector.broadcast %cst_14 : f32 to vector<16x128xf32>
    %48 = arith.addf %46, %47 : vector<16x128xf32>
    %49 = arith.addf %32, %35 : vector<16x128xf32>
    %cst_15 = arith.constant 8.99999984E-4 : f32
    %50 = vector.broadcast %cst_15 : f32 to vector<16x128xf32>
    %51 = arith.addf %49, %50 : vector<16x128xf32>
    %52 = arith.mulf %48, %51 : vector<16x128xf32>
    %53 = tpu.reciprocal %52 {approx = true} : vector<16x128xf32> -> vector<16x128xf32>
    %54 = arith.mulf %45, %53 : vector<16x128xf32>
    %cst_16 = arith.constant dense<0.000000e+00> : vector<128xf32>
    %55 = vector.multi_reduction <add>, %54, %cst_16 [0] : vector<16x128xf32> to vector<128xf32>
    %56 = vector.shape_cast %55 : vector<128xf32> to vector<1x128xf32>
    %57 = vector.shape_cast %56 : vector<1x128xf32> to vector<1x1x128xf32>
    %c0_17 = arith.constant 0 : index
    %c0_18 = arith.constant 0 : index
    %c0_19 = arith.constant 0 : index
    %58 = vector.load %arg5[%c0_17, %c0_18, %c0_19] : memref<1x1x128xf32, #tpu.memory_space<vmem>>, vector<1x1x128xf32>
    tpu.vector_store %arg5[%c0_17, %c0_18, %c0_19], %57 {strides = array<i32>} : memref<1x1x128xf32, #tpu.memory_space<vmem>>, vector<1x1x128xf32>,
    return
  }
  func.func @transform_0(%arg0: i32) -> (i32, i32) {
    %c0_i32 = arith.constant 0 : i32
    %c0_i32_0 = arith.constant 0 : i32
    return %arg0, %c0_i32 : i32, i32
  }
  func.func @transform_1(%arg0: i32) -> (i32, i32) {
    %c0_i32 = arith.constant 0 : i32
    %c0_i32_0 = arith.constant 0 : i32
    return %arg0, %c0_i32 : i32, i32
  }
  func.func @transform_2(%arg0: i32) -> (i32, i32) {
    %c0_i32 = arith.constant 0 : i32
    %c0_i32_0 = arith.constant 0 : i32
    %c0_i32_1 = arith.constant 0 : i32
    return %c0_i32, %c0_i32_0 : i32, i32
  }
  func.func @transform_3(%arg0: i32) -> (i32, i32) {
    %c0_i32 = arith.constant 0 : i32
    %c0_i32_0 = arith.constant 0 : i32
    %c0_i32_1 = arith.constant 0 : i32
    return %c0_i32, %c0_i32_0 : i32, i32
  }
  func.func @transform_4(%arg0: i32) -> (i32, i32, i32) {
    %c0_i32 = arith.constant 0 : i32
    %c0_i32_0 = arith.constant 0 : i32
    %c0_i32_1 = arith.constant 0 : i32
    return %arg0, %c0_i32, %c0_i32_0 : i32, i32, i32
  }
}

</mosaic_0001>

<bundles_post_ra>
// kernel: ssim_loss.1
= control target key start
LH: loop header
LB: loop body
LE: loop exit
PB: predicated region body
PF: predicated region fallthrough
CT: control target
= control target key end

     0   :  { %v477_v0 = vmov 0.0   ;;  %vm478_vm0 = vmmov 0   ;;  %vm210_vm1 = vcmask 654336   ;;  %s591_s2 = inlined_call_operand.vmem [shape: bf16[128,128], index: 2, kind: input, shape index: {}]   ;;  %s592_s0 = inlined_call_operand.vmem [shape: f32[16,128], index: 0, kind: input, shape index: {}]   ;;  %s593_s1 = inlined_call_operand.vmem [shape: f32[16,128], index: 1, kind: input, shape index: {}]   ;;  %s594_s3 = inlined_call_operand.vmem [shape: bf16[80,80], index: 3, kind: input, shape index: {}]   ;;  %s595_s4 = inlined_call_operand.vmem [shape: f32[1,1,128], index: 4, kind: output, shape index: {}]  }
   0x1   :  { %392 = vmatprep.subr.bf16.mxu0 %v477_v0  ;;  %v460_v1 = vld [vmem:[%s591_s2] sm:$0xff]   ;;  %408 = vmatprep.mubr.msk.bf16.mxu0 %vm478_vm0, %v477_v0  ;;  %v461_v2 = vld [vmem:[%s591_s2 + $0x8] sm:$0xff]   ;;  %v462_v3 = vld [vmem:[%s591_s2 + $0x10] sm:$0xff]  }
   0x2   :  { %428 = vmatprep.subr.bf16.mxu1 %v477_v0  ;;  %438 = vmatprep.mubr.msk.bf16.mxu1 %vm478_vm0, %v477_v0  ;;  %v463_v4 = vld [vmem:[%s591_s2 + $0x18] sm:$0xff]   ;;  %v464_v5 = vld [vmem:[%s591_s2 + $0x20] sm:$0xff]   ;;  %v465_v6 = vld [vmem:[%s591_s2 + $0x28] sm:$0xff]  }
   0x3   :  { %393 = vmatpush3.bf16.msra.mxu0 %v460_v1  ;;  %v466_v7 = vld [vmem:[%s591_s2 + $0x30] sm:$0xff]   ;;  %v467_v8 = vld [vmem:[%s591_s2 + $0x38] sm:$0xff]   ;;  %v18_v9 = vld [vmem:[%s592_s0] sm:$0xff] }
   0x4   :  { %394 = vmatprep.subr.bf16.mxu0 %v477_v0  ;;  %v19_v10 = vld [vmem:[%s592_s0 + $0x8] sm:$0xff]  ;;  %v20_v12 = vld [vmem:[%s593_s1] sm:$0xff]  ;;  %v24_v15 = vmul.f32 %v18_v9, %v18_v9  ;;  %v470_v51 = vld [vmem:[%s594_s3 + $0x10] sm:$0xff]  }
   0x5   :  { %v22_v11 = vpack.c.bf16 %v19_v10, %v18_v9  ;;  %v21_v13 = vld [vmem:[%s593_s1 + $0x8] sm:$0xff]  ;;  %v25_v16 = vmul.f32 %v19_v10, %v19_v10  ;;  %v27_v18 = vmul.f32 %v20_v12, %v20_v12  ;;  %v30_v21 = vmul.f32 %v20_v12, %v18_v9  ;;  %v468_v49 = vld [vmem:[%s594_s3] sm:$0xff]   ;;  %v471_v52 = vld [vmem:[%s594_s3 + $0x18] sm:$0xff]  }
   0x6   :  { %v23_v14 = vpack.c.bf16 %v21_v13, %v20_v12  ;;  %v28_v19 = vmul.f32 %v21_v13, %v21_v13  ;;  %v31_v22 = vmul.f32 %v21_v13, %v19_v10  ;;  %v469_v50 = vld [vmem:[%s594_s3 + $0x8] sm:$0xff]   ;;  %v472_v53 = vld [vmem:[%s594_s3 + $0x20] sm:$0xff]  }
   0x7   :  { %395 = vmatpush3.bf16.msra.mxu0 %v461_v2  ;;  %v26_v17 = vpack.c.bf16 %v25_v16, %v24_v15 }
   0x8   :  { %396 = vmatprep.subr.bf16.mxu0 %v477_v0  ;;  %v29_v20 = vpack.c.bf16 %v28_v19, %v27_v18  ;;  %v32_v23 = vpack.c.bf16 %v31_v22, %v30_v21 }
   0xb   :  { %397 = vmatpush3.bf16.msra.mxu0 %v462_v3 }
   0xc   :  { %398 = vmatprep.subr.bf16.mxu0 %v477_v0 }
   0xf   :  { %399 = vmatpush3.bf16.msra.mxu0 %v463_v4 }
  0x10   :  { %400 = vmatprep.subr.bf16.mxu0 %v477_v0 }
  0x13   :  { %401 = vmatpush3.bf16.msra.mxu0 %v464_v5 }
  0x14   :  { %402 = vmatprep.subr.bf16.mxu0 %v477_v0 }
  0x17   :  { %403 = vmatpush3.bf16.msra.mxu0 %v465_v6 }
  0x18   :  { %404 = vmatprep.subr.bf16.mxu0 %v477_v0 }
  0x1b   :  { %405 = vmatpush3.bf16.msra.mxu0 %v466_v7 }
  0x1c   :  { %406 = vmatprep.subr.bf16.mxu0 %v477_v0 }
  0x1f   :  { %407 = vmatpush3.bf16.msra.mxu0 %v467_v8 }
  0x22   :  { %409 = vmatmul.mubr.bf16.vlgmr.msra.gmra.mrb[0].mxu0 %v22_v11 }
  0x23   :  { %412 = vmatprep.mubr.msk.bf16.mxu0 %vm478_vm0, %v477_v0 }
  0x2a   :  { %413 = vmatmul.mubr.bf16.gmra.mrb[4].mxu0 %v23_v14 }
  0x2b   :  { %416 = vmatprep.mubr.msk.bf16.mxu0 %vm478_vm0, %v477_v0 }
  0x32   :  { %417 = vmatmul.mubr.bf16.gmra.mrb[8].mxu0 %v26_v17 }
  0x33   :  { %420 = vmatprep.mubr.msk.bf16.mxu0 %vm478_vm0, %v477_v0 }
  0x3a   :  { %421 = vmatmul.mubr.bf16.gmra.mrb[12].mxu0 %v29_v20 }
  0x3b   :  { %424 = vmatprep.mubr.msk.bf16.mxu0 %vm478_vm0, %v477_v0 }
  0x42   :  { %425 = vmatmul.mubr.bf16.gmra.mrb[16].mxu0 %v32_v23 }
  0xf5   :  { %v131_v24 = vpop.f32.mrb[0].mxu0 }
  0xf6   :  { %v410_v25 = vpop.f32.mrb[1].mxu0 }
  0xf7   :  { %v134_v26 = vpop.f32.mrb[2].mxu0 }
  0xf8   :  { %v170_v27 = vpack.c.bf16 %v134_v26, %v131_v24  ;;  %v411_v28 = vpop.f32.mrb[3].mxu0 }
  0xfa   :  { %429 = vmatpush3.bf16.msra.mxu1 %v170_v27 }
  0xfb   :  { %430 = vmatprep.subr.bf16.mxu1 %v477_v0 }
  0xfd   :  { %v139_v29 = vpop.f32.mrb[4].mxu0 }
  0xfe   :  { %v414_v30 = vpop.f32.mrb[5].mxu0 }
  0xff   :  { %v142_v31 = vpop.f32.mrb[6].mxu0 }
 0x100   :  { %v171_v32 = vpack.c.bf16 %v142_v31, %v139_v29  ;;  %v415_v33 = vpop.f32.mrb[7].mxu0 }
 0x102   :  { %431 = vmatpush3.bf16.msra.mxu1 %v171_v32 }
 0x103   :  { %432 = vmatprep.subr.bf16.mxu1 %v477_v0 }
 0x105   :  { %v147_v34 = vpop.f32.mrb[8].mxu0 }
 0x106   :  { %v418_v35 = vpop.f32.mrb[9].mxu0 }
 0x107   :  { %v150_v36 = vpop.f32.mrb[10].mxu0 }
 0x108   :  { %v172_v37 = vpack.c.bf16 %v150_v36, %v147_v34  ;;  %v419_v38 = vpop.f32.mrb[11].mxu0 }
 0x10a   :  { %433 = vmatpush3.bf16.msra.mxu1 %v172_v37 }
 0x10b   :  { %434 = vmatprep.subr.bf16.mxu1 %v477_v0 }
 0x10d   :  { %v155_v39 = vpop.f32.mrb[12].mxu0 }
 0x10e   :  { %v422_v40 = vpop.f32.mrb[13].mxu0 }
 0x10f   :  { %v158_v41 = vpop.f32.mrb[14].mxu0 }
 0x110   :  { %v173_v42 = vpack.c.bf16 %v158_v41, %v155_v39  ;;  %v423_v43 = vpop.f32.mrb[15].mxu0 }
 0x112   :  { %435 = vmatpush3.bf16.msra.mxu1 %v173_v42 }
 0x113   :  { %436 = vmatprep.subr.bf16.mxu1 %v477_v0 }
 0x115   :  { %v163_v44 = vpop.f32.mrb[16].mxu0 }
 0x116   :  { %v426_v45 = vpop.f32.mrb[17].mxu0 }
 0x117   :  { %v166_v46 = vpop.f32.mrb[18].mxu0 }
 0x118   :  { %v174_v47 = vpack.c.bf16 %v166_v46, %v163_v44  ;;  %v427_v48 = vpop.f32.mrb[19].mxu0 }
 0x11a   :  { %437 = vmatpush3.bf16.msra.mxu1 %v174_v47 }
 0x11d   :  { %439 = vmatmul.mubr.msk.bf16.vlgmr.msra.gmra.mrb[0].mxu1 %vm210_vm1, %v468_v49 }
 0x11e   :  { %442 = vmatprep.mubr.msk.bf16.mxu1 %vm478_vm0, %v477_v0 }
 0x125   :  { %443 = vmatmul.mubr.msk.bf16.gmra.mrb[4].mxu1 %vm210_vm1, %v469_v50 }
 0x126   :  { %446 = vmatprep.mubr.msk.bf16.mxu1 %vm478_vm0, %v477_v0 }
 0x12d   :  { %447 = vmatmul.mubr.msk.bf16.gmra.mrb[8].mxu1 %vm210_vm1, %v470_v51 }
 0x12e   :  { %450 = vmatprep.mubr.msk.bf16.mxu1 %vm478_vm0, %v477_v0 }
 0x135   :  { %451 = vmatmul.mubr.msk.bf16.gmra.mrb[12].mxu1 %vm210_vm1, %v471_v52 }
 0x136   :  { %454 = vmatprep.mubr.msk.bf16.mxu1 %vm478_vm0, %v477_v0 }
 0x13d   :  { %455 = vmatmul.mubr.msk.bf16.gmra.mrb[16].mxu1 %vm210_vm1, %v472_v53 }
 0x1f0   :  { %v260_v54 = vpop.f32.mrb[0].mxu1 }
 0x1f1   :  { %v440_v55 = vpop.f32.mrb[1].mxu1  ;;  %v299_v59 = vmul.f32 %v260_v54, %v260_v54 }
 0x1f2   :  { %v263_v56 = vpop.f32.mrb[2].mxu1 }
 0x1f3   :  { %v441_v57 = vpop.f32.mrb[3].mxu1  ;;  %v300_v1 = vmul.f32 %v263_v56, %v263_v56 }
 0x1f8   :  { %v268_v58 = vpop.f32.mrb[4].mxu1 }
 0x1f9   :  { %v301_v60 = vmul.f32 %v268_v58, %v268_v58  ;;  %v303_v61 = vmul.f32 %v268_v58, %v260_v54  ;;  %v444_v62 = vpop.f32.mrb[5].mxu1 }
 0x1fa   :  { %v271_v63 = vpop.f32.mrb[6].mxu1 }
 0x1fb   :  { %v325_v2 = vadd.f32 %v301_v60, %v299_v59  ;;  %v302_v3 = vmul.f32 %v271_v63, %v271_v63  ;;  %v304_v4 = vmul.f32 %v271_v63, %v263_v56  ;;  %v445_v0 = vpop.f32.mrb[7].mxu1  ;;  %v315_v26 = vmul.f32 2.0, %v303_v61 }
 0x1fd   :  { %v326_v5 = vadd.f32 %v302_v3, %v300_v1  ;;  %v327_v23 = vadd.f32 0.0001, %v325_v2  ;;  %v316_v33 = vmul.f32 2.0, %v304_v4  ;;  %v317_v39 = vadd.f32 0.0001, %v315_v26 }
 0x1ff   :  { %v328_v28 = vadd.f32 0.0001, %v326_v5  ;;  %v318_v42 = vadd.f32 0.0001, %v316_v33 }
 0x200   :  { %v276_v6 = vpop.f32.mrb[8].mxu1 }
 0x201   :  { %v305_v7 = vsub.f32 %v276_v6, %v299_v59  ;;  %v448_v8 = vpop.f32.mrb[9].mxu1 }
 0x202   :  { %v279_v9 = vpop.f32.mrb[10].mxu1 }
 0x203   :  { %v306_v10 = vsub.f32 %v279_v9, %v300_v1  ;;  %v449_v11 = vpop.f32.mrb[11].mxu1  ;;  %v307_v16 = vmax.f32 %v305_v7, 0.0 }
 0x205   :  { %v308_v20 = vmax.f32 %v306_v10, 0.0 }
 0x208   :  { %v284_v12 = vpop.f32.mrb[12].mxu1 }
 0x209   :  { %v309_v13 = vsub.f32 %v284_v12, %v301_v60  ;;  %v452_v14 = vpop.f32.mrb[13].mxu1 }
 0x20a   :  { %v287_v15 = vpop.f32.mrb[14].mxu1 }
 0x20b   :  { %v311_v17 = vmax.f32 %v309_v13, 0.0  ;;  %v310_v18 = vsub.f32 %v287_v15, %v302_v3  ;;  %v453_v19 = vpop.f32.mrb[15].mxu1 }
 0x20d   :  { %v329_v21 = vadd.f32 %v311_v17, %v307_v16  ;;  %v312_v22 = vmax.f32 %v310_v18, 0.0 }
 0x20f   :  { %v331_v24 = vadd.f32 0.0009, %v329_v21  ;;  %v330_v25 = vadd.f32 %v312_v22, %v308_v20 }
 0x210   :  { %v292_v27 = vpop.f32.mrb[16].mxu1 }
 0x211   :  { %v333_v29 = vmul.f32 %v331_v24, %v327_v23  ;;  %v332_v30 = vadd.f32 0.0009, %v330_v25  ;;  %v313_v31 = vsub.f32 %v292_v27, %v303_v61  ;;  %v456_v32 = vpop.f32.mrb[17].mxu1 }
 0x212   :  { %v295_v34 = vpop.f32.mrb[18].mxu1 }
 0x213   :  { %473 = vrcp.f32 %v333_v29  ;;  %v334_v35 = vmul.f32 %v332_v30, %v328_v28  ;;  %v319_v36 = vmul.f32 2.0, %v313_v31  ;;  %v314_v37 = vsub.f32 %v295_v34, %v304_v4  ;;  %v457_v38 = vpop.f32.mrb[19].mxu1 }
 0x215   :  { %475 = vrcp.f32 %v334_v35  ;;  %v321_v40 = vadd.f32 0.0009, %v319_v36  ;;  %v320_v41 = vmul.f32 2.0, %v314_v37 }
 0x217   :  { %v323_v43 = vmul.f32 %v321_v40, %v317_v39  ;;  %v322_v44 = vadd.f32 0.0009, %v320_v41 }
 0x219   :  { %v324_v45 = vmul.f32 %v322_v44, %v318_v42 }
 0x21d   :  { %v474_v46 = vpop.eup %473 }
 0x21e   :  { %v337_v47 = vmul.f32 %v474_v46, %v323_v43 }
 0x21f   :  { %v476_v48 = vpop.eup %475 }
 0x220   :  { %v338_v49 = vmul.f32 %v476_v48, %v324_v45 }
 0x222   :  { %v339_v50 = vadd.f32 %v338_v49, %v337_v47 }
 0x224   :  { %v340_v51 = vrot.slane %v339_v50, 4 }
 0x226   :  { %v341_v52 = vadd.f32 %v340_v51, %v339_v50 }
 0x228   :  { %v342_v53 = vrot.slane %v341_v52, 2 }
 0x22a   :  { %v343_v54 = vadd.f32 %v342_v53, %v341_v52 }
 0x22c   :  { %v344_v55 = vrot.slane %v343_v54, 1 }
 0x22e   :  { %v345_v56 = vadd.f32 %v344_v55, %v343_v54 }
 0x230   :  { %346 = vst [vmem:[%s595_s4] sm:$0x1] %v345_v56 }

</bundles_post_ra>
